<compile_context>
chip_gen: v6e
topology: v6e:2x2x1
jax: 0.10.0
libtpu: 0.0.40
codegen_flags: <defaults>
</compile_context>

<pallas_src>
import jax
import jax.numpy as jnp
from jax.experimental import pallas as pl
from jax.experimental.pallas import tpu as pltpu

H_PAD = 128  # lane-dense working width (hidden_dim padded up to a full vreg lane width)


def _round_up(n, m):
    return ((n + m - 1) // m) * m


def _pad2d(x, rows, cols, dtype):
    out = jnp.zeros((rows, cols), dtype)
    return out.at[: x.shape[0], : x.shape[1]].set(x.astype(dtype))


# ----------------------------- fused Pallas kernel -----------------------------

def _make_fused_kernel(node_types, edge_types, dst_types, edges_into, n_pad, row_off):
    """Builds a single kernel that performs the whole (last) Heteroconv layer."""
    nt_idx = {nt: i for i, nt in enumerate(node_types)}
    et_idx = {et: i for i, et in enumerate(edge_types)}
    n_nt, n_et, n_dt = len(node_types), len(edge_types), len(dst_types)

    def kernel(*refs):
        x_refs = refs[:n_nt]                                     # [N_pad, 128] bf16
        a_refs = refs[n_nt:n_nt + n_et]                          # [Nd_pad, Ns_pad] bf16
        w_refs = refs[n_nt + n_et:n_nt + n_et + n_dt]            # [(E+1)*128, 128] bf16
        b_refs = refs[n_nt + n_et + n_dt:n_nt + n_et + 2 * n_dt] # [1, 128] f32
        o_ref = refs[-1]                                         # [total_rows, 128] f32

        for di, dst in enumerate(dst_types):
            pieces = []
            for et in edges_into[dst]:
                src = et[0]
                # mean-aggregated neighbour features (MXU, f32 accumulation)
                agg = jnp.dot(a_refs[et_idx[et]][...], x_refs[nt_idx[src]][...],
                              preferred_element_type=jnp.float32)
                pieces.append(agg.astype(jnp.bfloat16))
            pieces.append(x_refs[nt_idx[dst]][...])              # root (lin_r) path
            # 128-lane-aligned concat -> one wide matmul per dst type (K >= 256)
            xcat = jnp.concatenate(pieces, axis=1) if len(pieces) > 1 else pieces[0]
            y = jnp.dot(xcat, w_refs[di][...], preferred_element_type=jnp.float32)
            y = y + b_refs[di][...]                              # bias (+ folded BN)
            r0 = row_off[dst]
            o_ref[r0:r0 + n_pad[dst], :] = y                     # lane-dense store

    return kernel


# --------------------------------- model glue ----------------------------------

class HeteroConvLayersPallas:
    """JAX/Pallas port of HeteroConvLayers (synthetic deterministic params).

    SAGEConv per edge type:  y = (A_mean @ X_src) @ W_l + X_dst @ W_r + b_l
    HeteroConv aggr='sum' over edge types sharing a destination type.
    """

    def __init__(self, node_types, edge_types, hidden_dim, num_layers, dropout, key):
        self.node_types = tuple(node_types)
        self.edge_types = tuple(edge_types)
        self.hidden_dim = hidden_dim
        self.num_layers = num_layers
        self.dropout = dropout

        # ---- raw per-layer / per-edge-type SAGEConv parameters ----
        bound = 1.0 / float(hidden_dim) ** 0.5
        self.params = []
        for li in range(num_layers):
            layer_p = {}
            for ei, et in enumerate(self.edge_types):
                k = jax.random.fold_in(jax.random.fold_in(key, li), ei)
                k1, k2, k3 = jax.random.split(k, 3)
                layer_p[et] = (
                    jax.random.uniform(k1, (hidden_dim, hidden_dim), jnp.float32, -bound, bound),
                    jax.random.uniform(k2, (hidden_dim, hidden_dim), jnp.float32, -bound, bound),
                    jax.random.uniform(k3, (hidden_dim,), jnp.float32, -bound, bound),
                )
            self.params.append(layer_p)

        # BatchNorm1d (eval mode, fresh module): gamma=1, beta=0, mean=0, var=1.
        self.bn_gamma = jnp.ones((hidden_dim,), jnp.float32)
        self.bn_beta = jnp.zeros((hidden_dim,), jnp.float32)
        self.bn_eps = 1e-5

        # ---- graph structure bookkeeping ----
        self.edges_into = {}
        for et in self.edge_types:
            self.edges_into.setdefault(et[2], []).append(et)
        # (PyG HeteroConv only emits node types that receive at least one edge type.)
        self.dst_types = tuple(nt for nt in self.node_types if nt in self.edges_into)

        # ---- pre-stacked, lane-padded weights (hoisted out of the call path) ----
        # Only the last Heteroconv layer's output survives the reference forward,
        # so only its weights are stacked.  Eval-mode BN (LP branch) is folded in.
        li = num_layers - 1
        self.w_stack, self.bias = {}, {}
        for lp in (False, True):
            scale = (self.bn_gamma / jnp.sqrt(1.0 + self.bn_eps)) if lp \
                else jnp.ones((hidden_dim,), jnp.float32)
            shift = self.bn_beta if lp else jnp.zeros((hidden_dim,), jnp.float32)
            wd, bd = {}, {}
            for dst in self.dst_types:
                blocks = []
                w_r_sum = jnp.zeros((hidden_dim, hidden_dim), jnp.float32)
                b_sum = jnp.zeros((hidden_dim,), jnp.float32)
                for et in self.edges_into[dst]:
                    w_l, w_r, b_l = self.params[li][et]
                    blocks.append(_pad2d(w_l * scale[None, :], H_PAD, H_PAD, jnp.float32))
                    w_r_sum = w_r_sum + w_r          # X_dst @ (sum_e W_r_e)
                    b_sum = b_sum + b_l              # sum of lin_l biases
                blocks.append(_pad2d(w_r_sum * scale[None, :], H_PAD, H_PAD, jnp.float32))
                wd[dst] = jnp.concatenate(blocks, axis=0).astype(jnp.bfloat16)
                bd[dst] = jnp.zeros((1, H_PAD), jnp.float32).at[0, :hidden_dim].set(
                    b_sum * scale + shift)
            self.w_stack[lp] = wd
            self.bias[lp] = bd

    def __call__(self, x_dict, adj_dict, LP=False):
        lp = bool(LP)
        hd = self.hidden_dim

        # Pad node rows to sublane multiples, hidden to 128 lanes; bf16 MXU inputs.
        n_pad = {nt: _round_up(x_dict[nt].shape[0], 8) for nt in self.node_types}
        xp = [_pad2d(x_dict[nt], n_pad[nt], H_PAD, jnp.bfloat16) for nt in self.node_types]
        ap = [_pad2d(adj_dict[et], n_pad[et[2]], n_pad[et[0]], jnp.bfloat16)
              for et in self.edge_types]

        row_off, off = {}, 0
        for dst in self.dst_types:
            row_off[dst] = off
            off += n_pad[dst]
        total_rows = off

        kernel = _make_fused_kernel(self.node_types, self.edge_types, self.dst_types,
                                    self.edges_into, n_pad, row_off)
        inputs = (xp + ap
                  + [self.w_stack[lp][dst] for dst in self.dst_types]
                  + [self.bias[lp][dst] for dst in self.dst_types])

        # One fused pallas_call: all edge types, cross-edge-type sum, bias/BN, all
        # dst node types written lane-dense into a single [rows, 128] slab.
        # No grid: every operand is tiny and fully resident in VMEM.
        # TODO(synk): at realistic graph sizes, tile dst rows with a "parallel"
        # grid axis (2-TC v7x) and size adjacency tiles for per-generation VMEM.
        out = pl.pallas_call(
            kernel,
            out_shape=jax.ShapeDtypeStruct((total_rows, H_PAD), jnp.float32),
            in_specs=[pl.BlockSpec(memory_space=pltpu.MemorySpace.VMEM)] * len(inputs),
            out_specs=pl.BlockSpec(memory_space=pltpu.MemorySpace.VMEM),
        )(*inputs)

        # TODO(synk): training-mode BatchNorm batch statistics and stochastic
        # Dropout are not modeled (eval-mode module assumed; Dropout is identity).
        result = {}
        for dst in self.dst_types:
            n = x_dict[dst].shape[0]
            r0 = row_off[dst]
            result[dst] = out[r0:r0 + n, :hd][None, ...]   # final unsqueeze(0)
        return result


# ----------------------------- pure-JAX reference ------------------------------

def _reference(model, x_dict, adj_dict, LP=False):
    li = model.num_layers - 1
    out = {}
    for et in model.edge_types:
        src, _, dst = et
        w_l, w_r, b_l = model.params[li][et]
        y = (adj_dict[et] @ x_dict[src]) @ w_l + x_dict[dst] @ w_r + b_l
        out[dst] = out.get(dst, 0.0) + y
    if LP:
        for dst in out:
            out[dst] = (out[dst] / jnp.sqrt(1.0 + model.bn_eps)) * model.bn_gamma + model.bn_beta
    return {dst: v[None, ...] for dst, v in out.items()}


# -------------------------------- demo / test -----------------------------------

if __name__ == "__main__":
    key = jax.random.PRNGKey(0)

    hidden_dim = 32
    num_layers = 2
    dropout = 0.5
    node_types = ("author", "paper")
    num_nodes = {"author": 24, "paper": 40}
    edge_types = (("author", "writes", "paper"),
                  ("paper", "rev_writes", "author"),
                  ("paper", "cites", "paper"))

    k_x, k_a, k_p = jax.random.split(key, 3)
    x_dict = {nt: jax.random.normal(jax.random.fold_in(k_x, i),
                                    (num_nodes[nt], hidden_dim), jnp.float32)
              for i, nt in enumerate(node_types)}

    adj_dict = {}
    for i, (src, rel, dst) in enumerate(edge_types):
        adj = jax.random.bernoulli(jax.random.fold_in(k_a, i), 0.3,
                                   (num_nodes[dst], num_nodes[src])).astype(jnp.float32)
        deg = jnp.sum(adj, axis=1, keepdims=True)
        adj_dict[(src, rel, dst)] = adj / jnp.maximum(deg, 1.0)   # mean aggregation

    model = HeteroConvLayersPallas(node_types, edge_types, hidden_dim,
                                   num_layers, dropout, k_p)

    for lp in (False, True):
        out = jax.block_until_ready(model(x_dict, adj_dict, LP=lp))
        ref = _reference(model, x_dict, adj_dict, LP=lp)
        assert out["author"].shape == (1, num_nodes["author"], hidden_dim)
        assert out["paper"].shape == (1, num_nodes["paper"], hidden_dim)
        for nt in out:
            assert bool(jnp.all(jnp.isfinite(out[nt])))
            assert bool(jnp.allclose(out[nt], ref[nt], atol=5e-2, rtol=5e-2)), nt

    print("KERNEL_OK")
</pallas_src>

<mosaic_0001>
module attributes {stable_mosaic.version = 11 : i64} {
  func.func @kernel(%arg0: memref<24x128xbf16, #tpu.memory_space<vmem>>, %arg1: memref<40x128xbf16, #tpu.memory_space<vmem>>, %arg2: memref<40x24xbf16, #tpu.memory_space<vmem>>, %arg3: memref<24x40xbf16, #tpu.memory_space<vmem>>, %arg4: memref<40x40xbf16, #tpu.memory_space<vmem>>, %arg5: memref<256x128xbf16, #tpu.memory_space<vmem>>, %arg6: memref<384x128xbf16, #tpu.memory_space<vmem>>, %arg7: memref<1x128xf32, #tpu.memory_space<vmem>>, %arg8: memref<1x128xf32, #tpu.memory_space<vmem>>, %arg9: memref<64x128xf32, #tpu.memory_space<vmem>>) attributes {dimension_semantics = [], scalar_prefetch = 0 : i64, scratch_operands = 0 : i64, tpu.core_type = #tpu.core_type<tc>} {
    %c0 = arith.constant 0 : index
    %c0_0 = arith.constant 0 : index
    %0 = vector.load %arg3[%c0, %c0_0] : memref<24x40xbf16, #tpu.memory_space<vmem>>, vector<24x40xbf16>
    %c0_1 = arith.constant 0 : index
    %c0_2 = arith.constant 0 : index
    %1 = vector.load %arg1[%c0_1, %c0_2] : memref<40x128xbf16, #tpu.memory_space<vmem>>, vector<40x128xbf16>
    %cst = arith.constant dense<0.000000e+00> : vector<24x128xf32>
    %2 = tpu.matmul %0, %1, %cst {dimension_numbers = #tpu.dot_dimension_numbers<[1], [0], [0], [1], [0, 0, 1, 1], [], []>} : vector<24x40xbf16>, vector<40x128xbf16>, vector<24x128xf32> -> vector<24x128xf32>
    %3 = arith.truncf %2 : vector<24x128xf32> to vector<24x128xbf16>
    %c0_3 = arith.constant 0 : index
    %c0_4 = arith.constant 0 : index
    %4 = vector.load %arg0[%c0_3, %c0_4] : memref<24x128xbf16, #tpu.memory_space<vmem>>, vector<24x128xbf16>
    %5 = tpu.concatenate %3, %4 in 1 : vector<24x128xbf16>, vector<24x128xbf16> -> vector<24x256xbf16>
    %c0_5 = arith.constant 0 : index
    %c0_6 = arith.constant 0 : index
    %6 = vector.load %arg5[%c0_5, %c0_6] : memref<256x128xbf16, #tpu.memory_space<vmem>>, vector<256x128xbf16>
    %cst_7 = arith.constant dense<0.000000e+00> : vector<24x128xf32>
    %7 = tpu.matmul %5, %6, %cst_7 {dimension_numbers = #tpu.dot_dimension_numbers<[1], [0], [0], [1], [0, 0, 1, 1], [], []>} : vector<24x256xbf16>, vector<256x128xbf16>, vector<24x128xf32> -> vector<24x128xf32>
    %c0_8 = arith.constant 0 : index
    %c0_9 = arith.constant 0 : index
    %8 = vector.load %arg7[%c0_8, %c0_9] : memref<1x128xf32, #tpu.memory_space<vmem>>, vector<1x128xf32>
    %9 = vector.broadcast %8 : vector<1x128xf32> to vector<24x128xf32>
    %10 = arith.addf %7, %9 : vector<24x128xf32>
    %c0_10 = arith.constant 0 : index
    %c0_11 = arith.constant 0 : index
    %11 = vector.load %arg9[%c0_10, %c0_11] : memref<64x128xf32, #tpu.memory_space<vmem>>, vector<24x128xf32>
    tpu.vector_store %arg9[%c0_10, %c0_11], %10 {strides = array<i32>} : memref<64x128xf32, #tpu.memory_space<vmem>>, vector<24x128xf32>,
    %c0_12 = arith.constant 0 : index
    %c0_13 = arith.constant 0 : index
    %12 = vector.load %arg2[%c0_12, %c0_13] : memref<40x24xbf16, #tpu.memory_space<vmem>>, vector<40x24xbf16>
    %c0_14 = arith.constant 0 : index
    %c0_15 = arith.constant 0 : index
    %13 = vector.load %arg0[%c0_14, %c0_15] : memref<24x128xbf16, #tpu.memory_space<vmem>>, vector<24x128xbf16>
    %cst_16 = arith.constant dense<0.000000e+00> : vector<40x128xf32>
    %14 = tpu.matmul %12, %13, %cst_16 {dimension_numbers = #tpu.dot_dimension_numbers<[1], [0], [0], [1], [0, 0, 1, 1], [], []>} : vector<40x24xbf16>, vector<24x128xbf16>, vector<40x128xf32> -> vector<40x128xf32>
    %15 = arith.truncf %14 : vector<40x128xf32> to vector<40x128xbf16>
    %c0_17 = arith.constant 0 : index
    %c0_18 = arith.constant 0 : index
    %16 = vector.load %arg4[%c0_17, %c0_18] : memref<40x40xbf16, #tpu.memory_space<vmem>>, vector<40x40xbf16>
    %c0_19 = arith.constant 0 : index
    %c0_20 = arith.constant 0 : index
    %17 = vector.load %arg1[%c0_19, %c0_20] : memref<40x128xbf16, #tpu.memory_space<vmem>>, vector<40x128xbf16>
    %cst_21 = arith.constant dense<0.000000e+00> : vector<40x128xf32>
    %18 = tpu.matmul %16, %17, %cst_21 {dimension_numbers = #tpu.dot_dimension_numbers<[1], [0], [0], [1], [0, 0, 1, 1], [], []>} : vector<40x40xbf16>, vector<40x128xbf16>, vector<40x128xf32> -> vector<40x128xf32>
    %19 = arith.truncf %18 : vector<40x128xf32> to vector<40x128xbf16>
    %c0_22 = arith.constant 0 : index
    %c0_23 = arith.constant 0 : index
    %20 = vector.load %arg1[%c0_22, %c0_23] : memref<40x128xbf16, #tpu.memory_space<vmem>>, vector<40x128xbf16>
    %21 = tpu.concatenate %15, %19, %20 in 1 : vector<40x128xbf16>, vector<40x128xbf16>, vector<40x128xbf16> -> vector<40x384xbf16>
    %c0_24 = arith.constant 0 : index
    %c0_25 = arith.constant 0 : index
    %22 = vector.load %arg6[%c0_24, %c0_25] : memref<384x128xbf16, #tpu.memory_space<vmem>>, vector<384x128xbf16>
    %cst_26 = arith.constant dense<0.000000e+00> : vector<40x128xf32>
    %23 = tpu.matmul %21, %22, %cst_26 {dimension_numbers = #tpu.dot_dimension_numbers<[1], [0], [0], [1], [0, 0, 1, 1], [], []>} : vector<40x384xbf16>, vector<384x128xbf16>, vector<40x128xf32> -> vector<40x128xf32>
    %c0_27 = arith.constant 0 : index
    %c0_28 = arith.constant 0 : index
    %24 = vector.load %arg8[%c0_27, %c0_28] : memref<1x128xf32, #tpu.memory_space<vmem>>, vector<1x128xf32>
    %25 = vector.broadcast %24 : vector<1x128xf32> to vector<40x128xf32>
    %26 = arith.addf %23, %25 : vector<40x128xf32>
    %c24 = arith.constant 24 : index
    %c0_29 = arith.constant 0 : index
    %27 = vector.load %arg9[%c24, %c0_29] : memref<64x128xf32, #tpu.memory_space<vmem>>, vector<40x128xf32>
    tpu.vector_store %arg9[%c24, %c0_29], %26 {strides = array<i32>} : memref<64x128xf32, #tpu.memory_space<vmem>>, vector<40x128xf32>,
    return
  }
}

</mosaic_0001>

<bundles_post_ra>
// kernel: tpu_custom_call.1
= control target key start
LH: loop header
LB: loop body
LE: loop exit
PB: predicated region body
PF: predicated region fallthrough
CT: control target
= control target key end

     0   :  { %14 = vsyncpa [#allocation3], 0  ;;  %s1522_s0 = inlined_call_operand.vmem [shape: bf16[24,128], index: 0, kind: input, shape index: {}]   ;;  %s1523_s1 = inlined_call_operand.vmem [shape: bf16[40,128], index: 1, kind: input, shape index: {}]   ;;  %s1524_s2 = inlined_call_operand.vmem [shape: bf16[40,24], index: 2, kind: input, shape index: {}]   ;;  %s1525_s3 = inlined_call_operand.hbm [shape: bf16[24,40], index: 3, kind: input, shape index: {}]   ;;  %s1526_s4 = inlined_call_operand.hbm [shape: bf16[40,40], index: 4, kind: input, shape index: {}]   ;;  %s1527_s5 = inlined_call_operand.hbm [shape: bf16[256,128], index: 5, kind: input, shape index: {}]   ;;  %s1528_s6 = inlined_call_operand.hbm [shape: bf16[384,128], index: 6, kind: input, shape index: {}]   ;;  %s1529_s7 = inlined_call_operand.vmem [shape: f32[1,128], index: 7, kind: input, shape index: {}]   ;;  %s1530_s8 = inlined_call_operand.vmem [shape: f32[1,128], index: 8, kind: input, shape index: {}]   ;;  %s1531_s9 = inlined_call_operand.hbm [shape: f32[64,128], index: 9, kind: output, shape index: {}]  }
   0x1   :  { %15 = vsyncpa [#allocation6], 0 }
   0x2   :  { %16 = vsyncpa [#allocation9], 0 }
   0x3   :  { %17 = vsyncpa [#allocation4], 0  ;;  %s1334_s30 = smov [#allocation5]   ;;  %s1335_s11 = smov [#allocation2]  }
   0x4   :  { %s41_s10 = sshll.u32 %s1334_s30, 4  ;;  %s29_s12 = sshll.u32 %s1335_s11, 4  ;;  %s42_s10 = int_to_ptr.vmem [resolvable:$true] %s41_s10  ;;  %s30_s12 = int_to_ptr.vmem [resolvable:$true] %s29_s12 }
   0x5   :  { %s1234_s13 = scalar_lea.vmem %s42_s10, 320  ;;  %p1239_p1 = scmp.lt.s32.totalorder %s42_s10, %s42_s10 }
   0x6   :  { %p1235_p0 = scmp.ne.s32.totalorder %s42_s10, %s1234_s13  ;;  %p1240_p2 = scmp.lt.s32.totalorder %s1234_s13, %s1234_s13 }
   0x8   :  { %p1241_p3 = por %p1240_p2, %p1239_p1 }
   0xa   :  { %p1242_p4 = pnand %p1241_p3, %p1235_p0 }
   0xc   :  { %1245 = shalt.err (!%p1242_p4)
}
   0xd   :  { %s1336_s14 = smov 64   ;;  %s1337_s15 = smov 4  }
   0xe   :  { %47 = dma.hbm_to_vmem [thread:$0]  %s1526_s4, 320, %s42_s10, [#allocation6], %s1336_s14, %s1336_s14, %s1337_s15  }
   0xf   :  { %s1254_s18 = scalar_lea.vmem %s30_s12, 192  ;;  %p1259_p6 = scmp.lt.s32.totalorder %s30_s12, %s30_s12 }
  0x10   :  { %p1255_p5 = scmp.ne.s32.totalorder %s30_s12, %s1254_s18  ;;  %p1260_p7 = scmp.lt.s32.totalorder %s1254_s18, %s1254_s18 }
  0x12   :  { %p1261_p8 = por %p1260_p7, %p1259_p6 }
  0x14   :  { %p1262_p9 = pnand %p1261_p8, %p1255_p5 }
  0x16   :  { %1265 = shalt.err (!%p1262_p9)
}
  0x17   :  { %35 = dma.hbm_to_vmem [thread:$0]  %s1525_s3, 192, %s30_s12, [#allocation3], %s1336_s14, %s1336_s14, %s1337_s15  }
  0x18   :  { %s1338_s21 = smov [#allocation7]   ;;  %s1339_s23 = smov [#allocation8]  }
  0x19   :  { %s53_s22 = sshll.u32 %s1338_s21, 4  ;;  %s65_s24 = sshll.u32 %s1339_s23, 4  ;;  %s54_s22 = int_to_ptr.vmem [resolvable:$true] %s53_s22  ;;  %s66_s24 = int_to_ptr.vmem [resolvable:$true] %s65_s24 }
  0x1a   :  { %s1274_s4 = scalar_lea.vmem %s54_s22, 2048  ;;  %p1279_p11 = scmp.lt.s32.totalorder %s54_s22, %s54_s22 }
  0x1b   :  { %p1275_p10 = scmp.ne.s32.totalorder %s54_s22, %s1274_s4  ;;  %p1280_p12 = scmp.lt.s32.totalorder %s1274_s4, %s1274_s4 }
  0x1d   :  { %p1281_p13 = por %p1280_p12, %p1279_p11 }
  0x1f   :  { %p1282_p0 = pnand %p1281_p13, %p1275_p10 }
  0x21   :  { %1285 = shalt.err (!%p1282_p0)
}
  0x22   :  { %59 = dma.hbm_to_vmem [thread:$0]  %s1527_s5, 2048, %s54_s22, [#allocation6], %s1336_s14, %s1336_s14, %s1337_s15  }
  0x23   :  { %s1294_s3 = scalar_lea.vmem %s66_s24, 3072  ;;  %p1299_p2 = scmp.lt.s32.totalorder %s66_s24, %s66_s24 }
  0x24   :  { %p1295_p1 = scmp.ne.s32.totalorder %s66_s24, %s1294_s3  ;;  %p1300_p3 = scmp.lt.s32.totalorder %s1294_s3, %s1294_s3 }
  0x26   :  { %p1301_p4 = por %p1300_p3, %p1299_p2 }
  0x28   :  { %p1302_p5 = pnand %p1301_p4, %p1295_p1 }
  0x2a   :  { %1305 = shalt.err (!%p1302_p5)
}
  0x2b   :  { %71 = dma.hbm_to_vmem [thread:$0]  %s1528_s6, 3072, %s66_s24, [#allocation9], %s1336_s14, %s1336_s14, %s1337_s15  }
  0x2c   :  { %1326 = dma.done.wait [#allocation3], 192  }
  0x2d   :  { %1327 = vsyncadd [#allocation3], 4294967104 }
  0x2e   :  { %1328 = dma.done.wait [#allocation6], 2368  }
  0x2f   :  { %1329 = vsyncadd [#allocation6], 4294964928 }
  0x30   :  { %1330 = dma.done.wait [#allocation9], 3072  }
  0x31   :  { %1331 = vsyncadd [#allocation9], 4294964224  ;;  %vm127_vm0 = vcmask 1043456   ;;  %v1168_v0 = vld [vmem:[%s1523_s1 + $0x10] ss:$0 sps:$4 sm:$0xff]   ;;  %v1169_v1 = vld [vmem:[%s1523_s1 + $0x8] sm:$0xff]  }
  0x32   :  { %1156 = vmatprep.subr.msk.bf16.mxu0 %vm127_vm0, %v1168_v0  ;;  %v129_v2 = vsel %vm127_vm0, %v1168_v0, 0  ;;  %vm120_vm1 = vcmask 326656   ;;  %v1171_v3 = vld [vmem:[#allocation2] sm:$0xff]   ;;  %v1173_v5 = vld [vmem:[%s1522_s0 + $0x8] ss:$0 sps:$4 sm:$0xff]   ;;  %v1340_v7 = vmov 0.0  }
  0x33   :  { %1085 = vmatpush3.bf16.msra.mxu0 %v129_v2  ;;  %v1170_v4 = vld [vmem:[%s1523_s1] sm:$0xff]   ;;  %1090 = vmatprep.mubr.msk.bf16.mxu0 %vm120_vm1, %v1171_v3  ;;  %v1172_v6 = vld [vmem:[#allocation2 + $0x8] ss:$0 sps:$4 sm:$0xff]   ;;  %v421_v8 = vsel %vm127_vm0, %v1173_v5, 0  ;;  %v1443_v10 = vld [vmem:[%s1523_s1 + $0x10] ss:$0 sps:$4 sm:$0xff]  }
  0x34   :  { %1086 = vmatprep.subr.bf16.mxu0 %v1169_v1  ;;  %v1174_v9 = vld [vmem:[%s1522_s0] sm:$0xff]   ;;  %v1184_v11 = vld [vmem:[#allocation7 + $0x78] sm:$0xff]   ;;  %vm1341_vm2 = vmmov 0   ;;  %v1186_v14 = vld [vmem:[#allocation7 + $0x70] sm:$0xff]   ;;  %vm410_vm3 = vcmask 195584   ;;  %v530_v17 = vsel %vm127_vm0, %v1443_v10, 0 }
  0x35   :  { %v1185_v12 = vld [vmem:[#allocation7 + $0x38] sm:$0xff]   ;;  %v1175_v13 = vld [vmem:[%s1524_s2] sm:$0xff]   ;;  %1000 = vmatprep.subr.bf16.mxu1 %v1184_v11  ;;  %v1187_v15 = vld [vmem:[#allocation7 + $0x30] sm:$0xff]  }
  0x36   :  { %1001 = vmatpush3.bf16.msra.mxu1 %v1185_v12  ;;  %v1188_v16 = vld [vmem:[#allocation7 + $0x68] sm:$0xff]   ;;  %v1190_v19 = vld [vmem:[#allocation7 + $0x60] sm:$0xff]   ;;  %v1192_v24 = vld [vmem:[#allocation7 + $0x58] sm:$0xff]  }
  0x37   :  { %1087 = vmatpush3.bf16.msra.mxu0 %v1169_v1  ;;  %1002 = vmatprep.subr.bf16.mxu1 %v1186_v14  ;;  %v1189_v18 = vld [vmem:[#allocation7 + $0x28] sm:$0xff]   ;;  %v1191_v22 = vld [vmem:[#allocation7 + $0x20] sm:$0xff]   ;;  %v1193_v25 = vld [vmem:[#allocation7 + $0x18] sm:$0xff]  }
  0x38   :  { %1088 = vmatprep.subr.bf16.mxu0 %v1170_v4  ;;  %v1460_v20 = vld [vmem:[%s1523_s1 + $0x8] sm:$0xff]   ;;  %v1469_v23 = vld [vmem:[%s1523_s1] sm:$0xff]   ;;  %v1194_v26 = vld [vmem:[#allocation7 + $0x50] sm:$0xff]  }
  0x39   :  { %v1177_v21 = vld [vmem:[%s1524_s2 + $0x8] sm:$0xff]   ;;  %v1195_v27 = vld [vmem:[#allocation7 + $0x10] sm:$0xff]   ;;  %v1183_v31 = vld [vmem:[#allocation5 + $0x10] ss:$0 sps:$4 sm:$0xff]  }
  0x3a   :  { %1003 = vmatpush3.bf16.msra.mxu1 %v1187_v15  ;;  %v1179_v28 = vld [vmem:[%s1524_s2 + $0x10] ss:$0 sps:$4 sm:$0xff]   ;;  %v1182_v30 = vld [vmem:[#allocation5 + $0x8] sm:$0xff]   ;;  %v1196_v32 = vld [vmem:[#allocation7 + $0x48] sm:$0xff]  }
  0x3b   :  { %1089 = vmatpush3.bf16.msra.mxu0 %v1170_v4  ;;  %1004 = vmatprep.subr.bf16.mxu1 %v1188_v16  ;;  %v1181_v29 = vld [vmem:[#allocation5] sm:$0xff]   ;;  %v1198_v34 = vld [vmem:[#allocation7 + $0x40] sm:$0xff]   ;;  %v1202_v36 = vld [vmem:[#allocation8 + $0xb8] sm:$0xff]  }
  0x3c   :  { %1094 = vmatprep.subr.bf16.mxu0 %v1340_v7  ;;  %v1197_v33 = vld [vmem:[#allocation7 + $0x8] sm:$0xff]   ;;  %v1199_v35 = vld [vmem:[#allocation7] sm:$0xff]   ;;  %v1201_v38 = vld [vmem:[#allocation8 + $0x78] sm:$0xff]  }
  0x3d   :  { %v1200_v37 = vld [vmem:[%s1522_s0] sm:$0xff]   ;;  %v1205_v39 = vld [vmem:[#allocation8 + $0xb0] sm:$0xff]   ;;  %v1209_v40 = vld [vmem:[#allocation8 + $0xa8] sm:$0xff]  }
  0x3e   :  { %1091 = vmatmul.mubr.msk.bf16.vlgmr.msra.gmra.mxu0 %vm120_vm1, %v1172_v6  ;;  %1005 = vmatpush3.bf16.msra.mxu1 %v1189_v18  ;;  %v1212_v41 = vld [vmem:[#allocation8 + $0xa0] sm:$0xff]   ;;  %v1215_v42 = vld [vmem:[#allocation8 + $0x98] sm:$0xff]   ;;  %v1218_v43 = vld [vmem:[#allocation8 + $0x90] sm:$0xff]  }
  0x3f   :  { %1095 = vmatpush3.bf16.msra.mxu0 %v421_v8  ;;  %1098 = vmatprep.mubr.msk.bf16.mxu0 %vm1341_vm2, %v1340_v7  ;;  %v1221_v44 = vld [vmem:[#allocation8 + $0x88] sm:$0xff]   ;;  %v1224_v45 = vld [vmem:[#allocation8 + $0x80] sm:$0xff]   ;;  %v1203_v50 = vld [vmem:[#allocation8 + $0x38] sm:$0xff]  }
  0x40   :  { %1096 = vmatprep.subr.bf16.mxu0 %v1340_v7  ;;  %1006 = vmatprep.subr.bf16.mxu1 %v1190_v19  ;;  %v1207_v51 = vld [vmem:[%s1522_s0 + $0x8] ss:$0 sps:$4 sm:$0xff]   ;;  %v1204_v53 = vld [vmem:[#allocation8 + $0x70] sm:$0xff]   ;;  %v1211_v62 = vld [vmem:[#allocation8 + $0x60] sm:$0xff]  }
  0x41   :  { %361 = vmatprep.mubr.bf16.mxu1 %v1200_v37  ;;  %v1206_v56 = vld [vmem:[#allocation8 + $0x30] sm:$0xff]   ;;  %v1208_v57 = vld [vmem:[#allocation8 + $0x68] sm:$0xff]   ;;  %v1213_v1 = vld [vmem:[#allocation8 + $0x20] sm:$0xff]  }
  0x42   :  { %1007 = vmatpush3.bf16.msra.mxu1 %v1191_v22  ;;  %v1210_v60 = vld [vmem:[#allocation8 + $0x28] sm:$0xff]   ;;  %v1214_v2 = vld [vmem:[#allocation8 + $0x58] sm:$0xff]   ;;  %v1217_v6 = vld [vmem:[#allocation8 + $0x50] sm:$0xff]  }
  0x43   :  { %1097 = vmatpush3.bf16.msra.mxu0 %v1174_v9  ;;  %1008 = vmatprep.subr.bf16.mxu1 %v1192_v24  ;;  %v1216_v5 = vld [vmem:[#allocation8 + $0x18] sm:$0xff]   ;;  %v1219_v9 = vld [vmem:[#allocation8 + $0x10] sm:$0xff]   ;;  %v1223_v14 = vld [vmem:[#allocation8 + $0x40] sm:$0xff]  }
  0x44   :  { %1110 = vmatprep.subr.bf16.mxu0 %v1340_v7 }
  0x46   :  { %1099 = vmatmul.mubr.msk.bf16.vlgmr.msra.gmra.mxu0 %vm410_vm3, %v1175_v13  ;;  %1009 = vmatpush3.bf16.msra.mxu1 %v1193_v25  ;;  %v1222_v13 = vld [vmem:[#allocation8 + $0x8] sm:$0xff]  }
  0x47   :  { %1111 = vmatpush3.bf16.msra.mxu0 %v530_v17  ;;  %1102 = vmatprep.mubr.msk.bf16.mxu0 %vm1341_vm2, %v1340_v7  ;;  %v1225_v17 = vld [vmem:[#allocation8] sm:$0xff]  }
  0x48   :  { %1112 = vmatprep.subr.bf16.mxu0 %v1340_v7  ;;  %1010 = vmatprep.subr.bf16.mxu1 %v1194_v26 }
  0x4a   :  { %1011 = vmatpush3.bf16.msra.mxu1 %v1195_v27 }
  0x4b   :  { %1113 = vmatpush3.bf16.msra.mxu0 %v1460_v20  ;;  %1012 = vmatprep.subr.bf16.mxu1 %v1196_v32 }
  0x4c   :  { %1114 = vmatprep.subr.bf16.mxu0 %v1340_v7 }
  0x4e   :  { %1103 = vmatmul.mubr.msk.bf16.gmra.mxu0 %vm410_vm3, %v1177_v21  ;;  %1013 = vmatpush3.bf16.msra.mxu1 %v1197_v33 }
  0x4f   :  { %1106 = vmatprep.mubr.msk.bf16.mxu0 %vm1341_vm2, %v1340_v7  ;;  %1115 = vmatpush3.bf16.msra.mxu0 %v1469_v23 }
  0x50   :  { %1128 = vmatprep.subr.bf16.mxu0 %v1340_v7  ;;  %1014 = vmatprep.subr.bf16.mxu1 %v1198_v34 }
  0x52   :  { %1015 = vmatpush3.bf16.msra.mxu1 %v1199_v35 }
  0x53   :  { %1039 = vmatprep.subr.bf16.mxu1 %v1201_v38 }
  0x56   :  { %1107 = vmatmul.mubr.msk.bf16.gmra.mxu0 %vm410_vm3, %v1179_v28 }
  0x57   :  { %1116 = vmatprep.mubr.msk.bf16.mxu0 %vm1341_vm2, %v1340_v7 }
  0x5e   :  { %1117 = vmatmul.mubr.msk.bf16.vlgmr.msra.gmra.mxu0 %vm120_vm1, %v1181_v29 }
  0x5f   :  { %1120 = vmatprep.mubr.msk.bf16.mxu0 %vm1341_vm2, %v1340_v7  ;;  %1129 = vmatpush3.bf16.msra.mxu0 %v1202_v36 }
  0x60   :  { %1130 = vmatprep.subr.bf16.mxu0 %v1340_v7 }
  0x63   :  { %1131 = vmatpush3.bf16.msra.mxu0 %v1205_v39 }
  0x64   :  { %1132 = vmatprep.subr.bf16.mxu0 %v1340_v7 }
  0x66   :  { %1121 = vmatmul.mubr.msk.bf16.gmra.mxu0 %vm120_vm1, %v1182_v30 }
  0x67   :  { %1124 = vmatprep.mubr.msk.bf16.mxu0 %vm1341_vm2, %v1340_v7  ;;  %1133 = vmatpush3.bf16.msra.mxu0 %v1209_v40 }
  0x68   :  { %1134 = vmatprep.subr.bf16.mxu0 %v1340_v7 }
  0x6b   :  { %1135 = vmatpush3.bf16.msra.mxu0 %v1212_v41 }
  0x6c   :  { %1136 = vmatprep.subr.bf16.mxu0 %v1340_v7 }
  0x6e   :  { %1125 = vmatmul.mubr.msk.bf16.gmra.mxu0 %vm120_vm1, %v1183_v31 }
  0x6f   :  { %1144 = vmatprep.mubr.msk.bf16.mxu0 %vm1341_vm2, %v1340_v7  ;;  %1137 = vmatpush3.bf16.msra.mxu0 %v1215_v42 }
  0x70   :  { %1138 = vmatprep.subr.bf16.mxu0 %v1340_v7 }
  0x73   :  { %1139 = vmatpush3.bf16.msra.mxu0 %v1218_v43 }
  0x74   :  { %1140 = vmatprep.subr.bf16.mxu0 %v1340_v7 }
  0x77   :  { %1141 = vmatpush3.bf16.msra.mxu0 %v1221_v44 }
  0x78   :  { %1142 = vmatprep.subr.bf16.mxu0 %v1340_v7 }
  0x7b   :  { %1143 = vmatpush3.bf16.msra.mxu0 %v1224_v45 }
  0x7e   :  { %1145 = vmatmul.mubr.bf16.vlgmr.msra.gmra.mxu0 %v1469_v23 }
  0x7f   :  { %1148 = vmatprep.mubr.msk.bf16.mxu0 %vm1341_vm2, %v1340_v7 }
  0x86   :  { %1149 = vmatmul.mubr.bf16.gmra.mxu0 %v1460_v20 }
  0x87   :  { %1152 = vmatprep.mubr.msk.bf16.mxu0 %vm1341_vm2, %v1340_v7 }
  0x8e   :  { %1153 = vmatmul.mubr.bf16.gmra.mxu0 %v1443_v10  ;;  %v1220_v10 = vld [vmem:[#allocation8 + $0x48] sm:$0xff]  }
  0xfe   :  { %v1092_v46 = vpop.f32.mrf.mxu0 }
  0xff   :  { %v180_v61 = vpack.c.bf16 %v1092_v46, %v1092_v46 }
 0x100   :  { %v165_v47 = vpop.f32.mrf.mxu0 }
 0x102   :  { %v1093_v48 = vpop.f32.mrf.mxu0 }
 0x104   :  { %v168_v49 = vpop.f32.mrf.mxu0 }
 0x105   :  { %v179_v52 = vpack.c.bf16 %v168_v49, %v165_v47  ;;  %v936_v47 = vld [vmem:[%s1529_s7] ss:$0 sm:$0xff]  ;;  %s1342_s7 = smov [#allocation10]  }
 0x106   :  { %v457_v54 = vpop.f32.mrf.mxu0 }
 0x107   :  { %362 = vmatmul.mubr.bf16.vlgmr.msra.gmra.mxu1 %v179_v52 }
 0x108   :  { %1040 = vmatpush3.bf16.msra.mxu1 %v1203_v50  ;;  %v1100_v55 = vpop.f32.mrf.mxu0  ;;  %369 = vmatprep.mubr.bf16.mxu1 %v1207_v51 }
 0x109   :  { %1041 = vmatprep.subr.bf16.mxu1 %v1204_v53 }
 0x10a   :  { %v460_v58 = vpop.f32.mrf.mxu0 }
 0x10b   :  { %v479_v21 = vpack.c.bf16 %v460_v58, %v457_v54 }
 0x10c   :  { %1042 = vmatpush3.bf16.msra.mxu1 %v1206_v56  ;;  %v1101_v59 = vpop.f32.mrf.mxu0 }
 0x10d   :  { %1043 = vmatprep.subr.bf16.mxu1 %v1208_v57 }
 0x10e   :  { %v465_v63 = vpop.f32.mrf.mxu0 }
 0x10f   :  { %370 = vmatmul.mubr.bf16.gmra.mxu1 %v180_v61 }
 0x110   :  { %1044 = vmatpush3.bf16.msra.mxu1 %v1210_v60  ;;  %v1104_v0 = vpop.f32.mrf.mxu0 }
 0x111   :  { %1045 = vmatprep.subr.bf16.mxu1 %v1211_v62  ;;  %v970_v62 = vld [vmem:[%s1530_s8] ss:$0 sm:$0xff]  ;;  %s913_s8 = sshll.u32 %s1342_s7, 4  ;;  %s914_s8 = int_to_ptr.vmem [resolvable:$true] %s913_s8 }
 0x112   :  { %v468_v3 = vpop.f32.mrf.mxu0  ;;  %s1306_s30 = scalar_lea.vmem %s914_s8, 1024  ;;  %p1311_p7 = scmp.lt.s32.totalorder %s914_s8, %s914_s8 }
 0x113   :  { %v480_v27 = vpack.c.bf16 %v468_v3, %v465_v63  ;;  %p1307_p6 = scmp.ne.s32.totalorder %s914_s8, %s1306_s30  ;;  %p1312_p8 = scmp.lt.s32.totalorder %s1306_s30, %s1306_s30 }
 0x114   :  { %1046 = vmatpush3.bf16.msra.mxu1 %v1213_v1  ;;  %v1105_v4 = vpop.f32.mrf.mxu0 }
 0x115   :  { %1047 = vmatprep.subr.bf16.mxu1 %v1214_v2  ;;  %p1313_p9 = por %p1312_p8, %p1311_p7 }
 0x116   :  { %v473_v7 = vpop.f32.mrf.mxu0 }
 0x117   :  { %v481_v33 = vpack.c.bf16 %v473_v7, %v473_v7  ;;  %p1314_p10 = pnand %p1313_p9, %p1307_p6 }
 0x118   :  { %1048 = vmatpush3.bf16.msra.mxu1 %v1216_v5  ;;  %v1108_v8 = vpop.f32.mrf.mxu0 }
 0x119   :  { %1049 = vmatprep.subr.bf16.mxu1 %v1217_v6 }
 0x11a   :  { %v476_v11 = vpop.f32.mrf.mxu0 }
 0x11c   :  { %1050 = vmatpush3.bf16.msra.mxu1 %v1219_v9  ;;  %v1109_v12 = vpop.f32.mrf.mxu0 }
 0x11d   :  { %1051 = vmatprep.subr.bf16.mxu1 %v1220_v10 }
 0x11e   :  { %v566_v15 = vpop.f32.mrf.mxu0 }
 0x120   :  { %1052 = vmatpush3.bf16.msra.mxu1 %v1222_v13  ;;  %v1118_v16 = vpop.f32.mrf.mxu0 }
 0x121   :  { %1053 = vmatprep.subr.bf16.mxu1 %v1223_v14 }
 0x122   :  { %v569_v18 = vpop.f32.mrf.mxu0 }
 0x123   :  { %v588_v19 = vpack.c.bf16 %v569_v18, %v566_v15 }
 0x124   :  { %1054 = vmatpush3.bf16.msra.mxu1 %v1225_v17  ;;  %v1119_v20 = vpop.f32.mrf.mxu0 }
 0x125   :  { %823 = vmatprep.mubr.bf16.mxu1 %v588_v19 }
 0x126   :  { %v574_v22 = vpop.f32.mrf.mxu0 }
 0x127   :  { %824 = vmatmul.mubr.bf16.vlgmr.msra.gmra.mxu1 %v479_v21 }
 0x128   :  { %v1122_v23 = vpop.f32.mrf.mxu0 }
 0x12a   :  { %v577_v24 = vpop.f32.mrf.mxu0 }
 0x12b   :  { %v589_v25 = vpack.c.bf16 %v577_v24, %v574_v22 }
 0x12c   :  { %v1123_v26 = vpop.f32.mrf.mxu0 }
 0x12d   :  { %831 = vmatprep.mubr.bf16.mxu1 %v589_v25 }
 0x12e   :  { %v582_v28 = vpop.f32.mrf.mxu0 }
 0x12f   :  { %v590_v29 = vpack.c.bf16 %v582_v28, %v582_v28  ;;  %832 = vmatmul.mubr.bf16.gmra.mxu1 %v480_v27 }
 0x130   :  { %v1126_v30 = vpop.f32.mrf.mxu0 }
 0x131   :  { %839 = vmatprep.mubr.bf16.mxu1 %v590_v29 }
 0x132   :  { %v585_v31 = vpop.f32.mrf.mxu0 }
 0x134   :  { %v1127_v32 = vpop.f32.mrf.mxu0 }
 0x137   :  { %840 = vmatmul.mubr.bf16.gmra.mxu1 %v481_v33 }
 0x13e   :  { %v881_v34 = vpop.f32.mrf.mxu0 }
 0x140   :  { %v1146_v35 = vpop.f32.mrf.mxu0 }
 0x142   :  { %v884_v36 = vpop.f32.mrf.mxu0 }
 0x144   :  { %v1147_v37 = vpop.f32.mrf.mxu0 }
 0x146   :  { %v889_v38 = vpop.f32.mrf.mxu0 }
 0x148   :  { %v1150_v39 = vpop.f32.mrf.mxu0 }
 0x14a   :  { %v892_v40 = vpop.f32.mrf.mxu0 }
 0x14c   :  { %v1151_v41 = vpop.f32.mrf.mxu0 }
 0x14e   :  { %v897_v42 = vpop.f32.mrf.mxu0 }
 0x150   :  { %v1154_v43 = vpop.f32.mrf.mxu0 }
 0x152   :  { %v900_v44 = vpop.f32.mrf.mxu0 }
 0x154   :  { %v1155_v45 = vpop.f32.mrf.mxu0 }
 0x1c7   :  { %v1016_v46 = vpop.f32.mrf.mxu1 }
 0x1c9   :  { %v1017_v48 = vpop.f32.mrf.mxu1 }
 0x1ca   :  { %v1018_v49 = vadd.f32 %v1017_v48, %v1016_v46 }
 0x1cb   :  { %v1019_v50 = vpop.f32.mrf.mxu1 }
 0x1cc   :  { %v364_v51 = vadd.f32 %v1018_v49, %v936_v47 }
 0x1cd   :  { %v1020_v52 = vpop.f32.mrf.mxu1 }
 0x1ce   :  { %377 = vst [vmem:[#allocation10] sm:$0xff] %v364_v51  ;;  %v1021_v53 = vadd.f32 %v1020_v52, %v1019_v50 }
 0x1cf   :  { %v1022_v54 = vpop.f32.mrf.mxu1 }
 0x1d0   :  { %v367_v55 = vadd.f32 %v1021_v53, %v936_v47 }
 0x1d1   :  { %v1023_v56 = vpop.f32.mrf.mxu1 }
 0x1d2   :  { %378 = vst [vmem:[#allocation10 + $0x8] sm:$0xff] %v367_v55  ;;  %v1024_v57 = vadd.f32 %v1023_v56, %v1022_v54 }
 0x1d3   :  { %v1025_v58 = vpop.f32.mrf.mxu1 }
 0x1d4   :  { %v372_v59 = vadd.f32 %v1024_v57, %v936_v47 }
 0x1d5   :  { %v1026_v60 = vpop.f32.mrf.mxu1 }
 0x1d6   :  { %379 = vst [vmem:[#allocation10 + $0x10] sm:$0xff] %v372_v59 }
 0x1e7   :  { %v1055_v61 = vpop.f32.mrf.mxu1 }
 0x1e9   :  { %v1056_v63 = vpop.f32.mrf.mxu1 }
 0x1ea   :  { %v1057_v0 = vadd.f32 %v1056_v63, %v1055_v61 }
 0x1eb   :  { %v1058_v1 = vpop.f32.mrf.mxu1 }
 0x1ec   :  { %v826_v2 = vadd.f32 %v1057_v0, %v970_v62 }
 0x1ed   :  { %v1059_v3 = vpop.f32.mrf.mxu1 }
 0x1ee   :  { %v882_v4 = vadd.f32 %v881_v34, %v826_v2  ;;  %v1060_v5 = vadd.f32 %v1059_v3, %v1058_v1 }
 0x1ef   :  { %v1061_v6 = vpop.f32.mrf.mxu1 }
 0x1f0   :  { %903 = vst [vmem:[#allocation10 + $0x18] sm:$0xff] %v882_v4  ;;  %v829_v7 = vadd.f32 %v1060_v5, %v970_v62 }
 0x1f1   :  { %v1062_v8 = vpop.f32.mrf.mxu1 }
 0x1f2   :  { %v885_v9 = vadd.f32 %v884_v36, %v829_v7  ;;  %v1063_v10 = vadd.f32 %v1062_v8, %v1061_v6 }
 0x1f3   :  { %v1064_v11 = vpop.f32.mrf.mxu1 }
 0x1f4   :  { %904 = vst [vmem:[#allocation10 + $0x20] sm:$0xff] %v885_v9  ;;  %v834_v12 = vadd.f32 %v1063_v10, %v970_v62 }
 0x1f5   :  { %v1065_v13 = vpop.f32.mrf.mxu1 }
 0x1f6   :  { %v890_v14 = vadd.f32 %v889_v38, %v834_v12  ;;  %v1066_v15 = vadd.f32 %v1065_v13, %v1064_v11 }
 0x1f7   :  { %v1067_v16 = vpop.f32.mrf.mxu1 }
 0x1f8   :  { %905 = vst [vmem:[#allocation10 + $0x28] sm:$0xff] %v890_v14  ;;  %v837_v17 = vadd.f32 %v1066_v15, %v970_v62 }
 0x1f9   :  { %v1068_v18 = vpop.f32.mrf.mxu1 }
 0x1fa   :  { %v893_v19 = vadd.f32 %v892_v40, %v837_v17  ;;  %v1069_v20 = vadd.f32 %v1068_v18, %v1067_v16 }
 0x1fb   :  { %v1070_v21 = vpop.f32.mrf.mxu1 }
 0x1fc   :  { %906 = vst [vmem:[#allocation10 + $0x30] sm:$0xff] %v893_v19  ;;  %v842_v22 = vadd.f32 %v1069_v20, %v970_v62 }
 0x1fd   :  { %v1071_v23 = vpop.f32.mrf.mxu1 }
 0x1fe   :  { %v898_v24 = vadd.f32 %v897_v42, %v842_v22 }
 0x200   :  { %907 = vst [vmem:[#allocation10 + $0x38] sm:$0xff] %v898_v24 }
 0x201   :  { %1317 = shalt.err (!%p1314_p10)
}
 0x202   :  { %s1343_s10 = smov 128   ;;  %s1344_s6 = smov 8  }
 0x203   :  { %919 = dma.vmem_to_hbm [thread:$0]  %s914_s8, 1024, %s1531_s9, [#allocation4], %s1343_s10, %s1343_s10, %s1344_s6  }
 0x204   :  { %1332 = dma.done.wait [#allocation4], 1024  }
 0x205   :  { %1333 = vsyncadd [#allocation4], 4294966272 }
 0x206   :  { %923 = vsyncpa [#allocation3], 1 }
 0x207   :  { %924 = vsyncpa [#allocation6], 1 }
 0x208   :  { %925 = vsyncpa [#allocation9], 1 }
 0x209   :  { %926 = vsyncpa [#allocation4], 1 }

</bundles_post_ra>
